<compile_context>
chip_gen: v6e
topology: v6e:2x2x1
jax: 0.10.0
libtpu: 0.0.40
codegen_flags: <defaults>
</compile_context>

<pallas_src>
import jax
import jax.numpy as jnp
from jax.experimental import pallas as pl
from jax.experimental.pallas import tpu as pltpu


def _leaky_relu(x, negative_slope):
    return jnp.where(x > 0, x, negative_slope * x)


def _pick_t_tile(B, T):
    """Largest lane-aligned tile <= 1024 that divides T, keeping >= 4 programs when possible."""
    t = min(T, 1024)
    t -= t % 128
    while T % t:
        t -= 128
    # v7x has 2 TensorCores: keep enough parallel programs to feed both.
    while (B * (T // t) < 4 and t > 128
           and (t // 2) % 128 == 0 and T % (t // 2) == 0):
        t //= 2
    return t


def basic_block_forward(x,
                        conv1_w, conv1_b, bn1_gamma, bn1_beta, bn1_mean, bn1_var,
                        conv2_w, conv2_b, bn2_gamma, bn2_beta, bn2_mean, bn2_var,
                        *, t_tile=None, negative_slope=0.01, eps=1e-5):
    """BasicBlock forward. x: (B, C, T) NCL, conv*_w: (planes, in, 3). Returns (B, C, T)."""
    B, C, T = x.shape
    P = conv1_w.shape[0]                               # planes
    assert P == C, "downsample=None requires inplanes == planes"
    assert conv1_w.shape == (P, C, 3) and conv2_w.shape == (P, P, 3)
    assert T % 128 == 0, "T must be a multiple of 128 (lane alignment)"
    if t_tile is None:
        t_tile = _pick_t_tile(B, T)
    assert T % t_tile == 0 and t_tile % 128 == 0
    n_t = T // t_tile
    Tw = t_tile + 2                                    # conv1 output width per tile

    f32 = jnp.float32
    # ---- fold eval-mode BatchNorm1d into the conv weights / biases ------------
    s1 = (bn1_gamma / jnp.sqrt(bn1_var + eps)).astype(f32)
    s2 = (bn2_gamma / jnp.sqrt(bn2_var + eps)).astype(f32)
    w1 = conv1_w.astype(f32) * s1[:, None, None]                      # (P, C, 3)
    w2 = conv2_w.astype(f32) * s2[:, None, None]                      # (P, P, 3)
    b1 = ((conv1_b.astype(f32) - bn1_mean) * s1 + bn1_beta).reshape(P, 1)
    b2 = ((conv2_b.astype(f32) - bn2_mean) * s2 + bn2_beta).reshape(P, 1)

    # Fused-tap weights: row p, column k*Cin + c  -> one matmul with K = 3*Cin.
    w1f = jnp.transpose(w1, (0, 2, 1)).reshape(P, 3 * C).astype(x.dtype)
    w2f = jnp.transpose(w2, (0, 2, 1)).reshape(P, 3 * P).astype(x.dtype)

    # ---- tiny halo side-array (replaces the full jnp.pad HBM copy) ------------
    # halos[b, t, :, 0:2] = x[b, :, t*tt-2 : t*tt]        (zeros for t == 0)
    # halos[b, t, :, 2:4] = x[b, :, (t+1)*tt : (t+1)*tt+2] (zeros for t == n_t-1)
    xt = x.reshape(B, C, n_t, t_tile)
    z2 = jnp.zeros((B, C, 1, 2), x.dtype)
    lh = jnp.concatenate([z2, xt[:, :, :-1, -2:]], axis=2)            # (B, C, n_t, 2)
    rh = jnp.concatenate([xt[:, :, 1:, :2], z2], axis=2)              # (B, C, n_t, 2)
    halos = jnp.transpose(jnp.concatenate([lh, rh], axis=-1), (0, 2, 1, 3))  # (B, n_t, C, 4)

    def kernel(hl_ref, xc_ref, w1_ref, b1_ref, w2_ref, b2_ref, o_ref):
        t = pl.program_id(1)
        n_t_k = pl.num_programs(1)

        hl = hl_ref[0, 0]                               # (C, 4)   zero-baked edge halos
        xc = xc_ref[0]                                  # (C, tT)  this tile's input (the shortcut)

        # Extended window: global columns [g0-2, g0+tT+2), zeros outside [0, T).
        xe = jnp.concatenate([hl[:, 0:2], xc, hl[:, 2:4]], axis=1)    # (C, tT+4)

        # --- conv1 (k=3, pad=1) + folded BN1 as a single K=3C matmul -----------
        x3 = jnp.concatenate([xe[:, 0:Tw],              # x[g-1]
                              xe[:, 1:Tw + 1],          # x[g]
                              xe[:, 2:Tw + 2]],         # x[g+1]
                             axis=0)                    # (3C, tT+2)
        h = jnp.dot(w1_ref[...], x3, preferred_element_type=jnp.float32)
        h = h + b1_ref[...]                             # bias added once, in f32
        a = _leaky_relu(h, negative_slope)

        # conv2 must see zeros outside [0, T): only the first column of the first
        # tile and the last column of the last tile can be invalid; the predicate
        # is all-True on interior tiles.
        col = jax.lax.broadcasted_iota(jnp.int32, (1, Tw), 1)
        keep = jnp.logical_and(jnp.logical_or(col > 0, t > 0),
                               jnp.logical_or(col < Tw - 1, t < n_t_k - 1))
        a = jnp.where(keep, a, 0.0).astype(xc.dtype)    # matmul operands stay in model dtype

        # --- conv2 (k=3, pad=1) + folded BN2 as a single K=3P matmul -----------
        a3 = jnp.concatenate([a[:, 0:t_tile],
                              a[:, 1:t_tile + 1],
                              a[:, 2:t_tile + 2]], axis=0)            # (3P, tT)
        y = jnp.dot(w2_ref[...], a3, preferred_element_type=jnp.float32)
        y = y + b2_ref[...]

        # Residual (pre-conv input) + final LeakyReLU, elementwise in f32.
        z = y + xc.astype(jnp.float32)
        o_ref[0] = _leaky_relu(z, negative_slope).astype(o_ref.dtype)

    itemsize = x.dtype.itemsize
    flops = int(2 * B * T * (3 * C * P + 3 * P * P) + 8 * B * T * P)
    bytes_accessed = int(itemsize * (2 * B * C * T + halos.size + w1f.size + w2f.size)
                         + 4 * (b1.size + b2.size))

    out = pl.pallas_call(
        kernel,
        out_shape=jax.ShapeDtypeStruct((B, C, T), x.dtype),
        grid=(B, n_t),
        in_specs=[
            pl.BlockSpec((1, 1, C, 4),   lambda b, t: (b, t, 0, 0)),   # tiny halo block
            pl.BlockSpec((1, C, t_tile), lambda b, t: (b, 0, t)),      # lane-dense centre block
            pl.BlockSpec((P, 3 * C), lambda b, t: (0, 0)),
            pl.BlockSpec((P, 1),     lambda b, t: (0, 0)),
            pl.BlockSpec((P, 3 * P), lambda b, t: (0, 0)),
            pl.BlockSpec((P, 1),     lambda b, t: (0, 0)),
        ],
        out_specs=pl.BlockSpec((1, C, t_tile), lambda b, t: (b, 0, t)),
        compiler_params=pltpu.CompilerParams(
            dimension_semantics=("parallel", "parallel")),
        cost_estimate=pl.CostEstimate(flops=flops, transcendentals=0,
                                      bytes_accessed=bytes_accessed),
    )(halos, x, w1f, b1, w2f, b2)
    return out


def _reference(x, c1w, c1b, g1, be1, m1, v1, c2w, c2b, g2, be2, m2, v2,
               *, negative_slope=0.01, eps=1e-5):
    """Plain-JAX reference matching PyTorch BasicBlock (eval-mode BN)."""
    def conv(h, w, b):
        y = jax.lax.conv_general_dilated(
            h, w, window_strides=(1,), padding=((1, 1),),
            dimension_numbers=("NCH", "OIH", "NCH"),
            precision=jax.lax.Precision.HIGHEST)
        return y + b[None, :, None]

    def bn(h, g, be, m, v):
        return (h - m[None, :, None]) * (g / jnp.sqrt(v + eps))[None, :, None] + be[None, :, None]

    def act(h):
        return jnp.where(h > 0, h, negative_slope * h)

    shortcut = x
    h = act(bn(conv(x, c1w, c1b), g1, be1, m1, v1))
    h = bn(conv(h, c2w, c2b), g2, be2, m2, v2)
    return act(h + shortcut)


if __name__ == "__main__":
    # Small demo shapes: batch=2, inplanes=planes=16, T=1024.
    # t_tile auto-picks 512 -> grid (2, 2) = 4 parallel programs (feeds both
    # TensorCores on v7x; irrelevant on v5e/v6e).
    B, C, T = 2, 16, 1024

    key = jax.random.PRNGKey(0)
    ks = jax.random.split(key, 13)

    x = jax.random.normal(ks[0], (B, C, T), dtype=jnp.float32)

    conv1_w = jax.random.normal(ks[1], (C, C, 3), jnp.float32) * 0.1
    conv1_b = jax.random.normal(ks[2], (C,), jnp.float32) * 0.1
    bn1_gamma = 1.0 + 0.1 * jax.random.normal(ks[3], (C,), jnp.float32)
    bn1_beta = 0.1 * jax.random.normal(ks[4], (C,), jnp.float32)
    bn1_mean = 0.1 * jax.random.normal(ks[5], (C,), jnp.float32)
    bn1_var = 0.5 + jax.random.uniform(ks[6], (C,), jnp.float32)

    conv2_w = jax.random.normal(ks[7], (C, C, 3), jnp.float32) * 0.1
    conv2_b = jax.random.normal(ks[8], (C,), jnp.float32) * 0.1
    bn2_gamma = 1.0 + 0.1 * jax.random.normal(ks[9], (C,), jnp.float32)
    bn2_beta = 0.1 * jax.random.normal(ks[10], (C,), jnp.float32)
    bn2_mean = 0.1 * jax.random.normal(ks[11], (C,), jnp.float32)
    bn2_var = 0.5 + jax.random.uniform(ks[12], (C,), jnp.float32)

    out = basic_block_forward(
        x, conv1_w, conv1_b, bn1_gamma, bn1_beta, bn1_mean, bn1_var,
        conv2_w, conv2_b, bn2_gamma, bn2_beta, bn2_mean, bn2_var)
    out = jax.block_until_ready(out)

    ref = _reference(
        x, conv1_w, conv1_b, bn1_gamma, bn1_beta, bn1_mean, bn1_var,
        conv2_w, conv2_b, bn2_gamma, bn2_beta, bn2_mean, bn2_var)

    assert out.shape == (B, C, T)
    err = jnp.max(jnp.abs(out - ref))
    assert jnp.allclose(out, ref, atol=5e-3, rtol=5e-3), f"mismatch vs reference, max abs err={err}"

    print("KERNEL_OK")
</pallas_src>

<mosaic_0001>
module attributes {stable_mosaic.version = 11 : i64} {
  func.func @kernel(%arg0: i32, %arg1: i32, %arg2: memref<1x1x16x4xf32, #tpu.memory_space<vmem>>, %arg3: memref<1x16x512xf32, #tpu.memory_space<vmem>>, %arg4: memref<16x48xf32, #tpu.memory_space<vmem>>, %arg5: memref<16x1xf32, #tpu.memory_space<vmem>>, %arg6: memref<16x48xf32, #tpu.memory_space<vmem>>, %arg7: memref<16x1xf32, #tpu.memory_space<vmem>>, %arg8: memref<1x16x512xf32, #tpu.memory_space<vmem>>) attributes {dimension_semantics = [#tpu.dimension_semantics<parallel>, #tpu.dimension_semantics<parallel>], iteration_bounds = array<i64: 2, 2>, scalar_prefetch = 0 : i64, scratch_operands = 0 : i64, tpu.core_type = #tpu.core_type<tc>, window_params = [{transform_indices = @transform_0, window_bounds = array<i64: 1, 1, 16, 4>}, {transform_indices = @transform_1, window_bounds = array<i64: 1, 16, 512>}, {pipeline_mode = #tpu.pipeline_mode<synchronous>, transform_indices = @transform_2, window_bounds = array<i64: 16, 48>}, {pipeline_mode = #tpu.pipeline_mode<synchronous>, transform_indices = @transform_3, window_bounds = array<i64: 16, 1>}, {pipeline_mode = #tpu.pipeline_mode<synchronous>, transform_indices = @transform_4, window_bounds = array<i64: 16, 48>}, {pipeline_mode = #tpu.pipeline_mode<synchronous>, transform_indices = @transform_5, window_bounds = array<i64: 16, 1>}, {transform_indices = @transform_6, window_bounds = array<i64: 1, 16, 512>}]} {
    %c0 = arith.constant 0 : index
    %c0_0 = arith.constant 0 : index
    %c0_1 = arith.constant 0 : index
    %c0_2 = arith.constant 0 : index
    %0 = vector.load %arg2[%c0, %c0_0, %c0_1, %c0_2] : memref<1x1x16x4xf32, #tpu.memory_space<vmem>>, vector<1x1x16x4xf32>
    %1 = vector.shape_cast %0 : vector<1x1x16x4xf32> to vector<16x4xf32>
    %c0_3 = arith.constant 0 : index
    %c0_4 = arith.constant 0 : index
    %c0_5 = arith.constant 0 : index
    %2 = vector.load %arg3[%c0_3, %c0_4, %c0_5] : memref<1x16x512xf32, #tpu.memory_space<vmem>>, vector<1x16x512xf32>
    %3 = vector.shape_cast %2 : vector<1x16x512xf32> to vector<16x512xf32>
    %4 = vector.extract_strided_slice %1 {offsets = [0, 0], sizes = [16, 2], strides = [1, 1]} : vector<16x4xf32> to vector<16x2xf32>
    %5 = vector.extract_strided_slice %1 {offsets = [0, 2], sizes = [16, 2], strides = [1, 1]} : vector<16x4xf32> to vector<16x2xf32>
    %6 = tpu.concatenate %4, %3, %5 in 1 : vector<16x2xf32>, vector<16x512xf32>, vector<16x2xf32> -> vector<16x516xf32>
    %7 = vector.extract_strided_slice %6 {offsets = [0, 0], sizes = [16, 514], strides = [1, 1]} : vector<16x516xf32> to vector<16x514xf32>
    %8 = vector.extract_strided_slice %6 {offsets = [0, 1], sizes = [16, 514], strides = [1, 1]} : vector<16x516xf32> to vector<16x514xf32>
    %9 = vector.extract_strided_slice %6 {offsets = [0, 2], sizes = [16, 514], strides = [1, 1]} : vector<16x516xf32> to vector<16x514xf32>
    %10 = tpu.concatenate %7, %8, %9 in 0 : vector<16x514xf32>, vector<16x514xf32>, vector<16x514xf32> -> vector<48x514xf32>
    %c0_6 = arith.constant 0 : index
    %c0_7 = arith.constant 0 : index
    %11 = vector.load %arg4[%c0_6, %c0_7] : memref<16x48xf32, #tpu.memory_space<vmem>>, vector<16x48xf32>
    %cst = arith.constant dense<0.000000e+00> : vector<16x514xf32>
    %12 = tpu.matmul %11, %10, %cst {dimension_numbers = #tpu.dot_dimension_numbers<[1], [0], [0], [1], [0, 0, 1, 1], [], []>} : vector<16x48xf32>, vector<48x514xf32>, vector<16x514xf32> -> vector<16x514xf32>
    %c0_8 = arith.constant 0 : index
    %c0_9 = arith.constant 0 : index
    %13 = vector.load %arg5[%c0_8, %c0_9] : memref<16x1xf32, #tpu.memory_space<vmem>>, vector<16x1xf32>
    %14 = vector.broadcast %13 : vector<16x1xf32> to vector<16x514xf32>
    %15 = arith.addf %12, %14 : vector<16x514xf32>
    %cst_10 = arith.constant 0.000000e+00 : f32
    %16 = vector.broadcast %cst_10 : f32 to vector<16x514xf32>
    %17 = arith.cmpf ogt, %15, %16 : vector<16x514xf32>
    %cst_11 = arith.constant 0.00999999977 : f32
    %18 = vector.broadcast %cst_11 : f32 to vector<16x514xf32>
    %19 = arith.mulf %18, %15 : vector<16x514xf32>
    %20 = arith.select %17, %15, %19 : vector<16x514xi1>, vector<16x514xf32>
    %21 = tpu.iota {dimensions = array<i32: 1>} : vector<1x514xi32>
    %c0_i32 = arith.constant 0 : i32
    %22 = vector.broadcast %c0_i32 : i32 to vector<1x514xi32>
    %23 = arith.cmpi sgt, %21, %22 : vector<1x514xi32>
    %c0_i32_12 = arith.constant 0 : i32
    %24 = arith.cmpi sgt, %arg1, %c0_i32_12 : i32
    %25 = vector.broadcast %24 : i1 to vector<1x514xi1>
    %26 = arith.ori %23, %25 : vector<1x514xi1>
    %c513_i32 = arith.constant 513 : i32
    %27 = vector.broadcast %c513_i32 : i32 to vector<1x514xi32>
    %28 = arith.cmpi slt, %21, %27 : vector<1x514xi32>
    %c1_i32 = arith.constant 1 : i32
    %29 = arith.cmpi slt, %arg1, %c1_i32 : i32
    %30 = vector.broadcast %29 : i1 to vector<1x514xi1>
    %31 = arith.ori %28, %30 : vector<1x514xi1>
    %32 = arith.andi %26, %31 : vector<1x514xi1>
    %cst_13 = arith.constant 0.000000e+00 : f32
    %33 = vector.shape_cast %32 : vector<1x514xi1> to vector<1x514xi1>
    %34 = vector.broadcast %33 : vector<1x514xi1> to vector<16x514xi1>
    %35 = vector.broadcast %cst_13 : f32 to vector<16x514xf32>
    %36 = arith.select %34, %20, %35 : vector<16x514xi1>, vector<16x514xf32>
    %37 = vector.extract_strided_slice %36 {offsets = [0, 0], sizes = [16, 512], strides = [1, 1]} : vector<16x514xf32> to vector<16x512xf32>
    %38 = vector.extract_strided_slice %36 {offsets = [0, 1], sizes = [16, 512], strides = [1, 1]} : vector<16x514xf32> to vector<16x512xf32>
    %39 = vector.extract_strided_slice %36 {offsets = [0, 2], sizes = [16, 512], strides = [1, 1]} : vector<16x514xf32> to vector<16x512xf32>
    %40 = tpu.concatenate %37, %38, %39 in 0 : vector<16x512xf32>, vector<16x512xf32>, vector<16x512xf32> -> vector<48x512xf32>
    %c0_14 = arith.constant 0 : index
    %c0_15 = arith.constant 0 : index
    %41 = vector.load %arg6[%c0_14, %c0_15] : memref<16x48xf32, #tpu.memory_space<vmem>>, vector<16x48xf32>
    %cst_16 = arith.constant dense<0.000000e+00> : vector<16x512xf32>
    %42 = tpu.matmul %41, %40, %cst_16 {dimension_numbers = #tpu.dot_dimension_numbers<[1], [0], [0], [1], [0, 0, 1, 1], [], []>} : vector<16x48xf32>, vector<48x512xf32>, vector<16x512xf32> -> vector<16x512xf32>
    %c0_17 = arith.constant 0 : index
    %c0_18 = arith.constant 0 : index
    %43 = vector.load %arg7[%c0_17, %c0_18] : memref<16x1xf32, #tpu.memory_space<vmem>>, vector<16x1xf32>
    %44 = vector.broadcast %43 : vector<16x1xf32> to vector<16x512xf32>
    %45 = arith.addf %42, %44 : vector<16x512xf32>
    %46 = arith.addf %45, %3 : vector<16x512xf32>
    %cst_19 = arith.constant 0.000000e+00 : f32
    %47 = vector.broadcast %cst_19 : f32 to vector<16x512xf32>
    %48 = arith.cmpf ogt, %46, %47 : vector<16x512xf32>
    %cst_20 = arith.constant 0.00999999977 : f32
    %49 = vector.broadcast %cst_20 : f32 to vector<16x512xf32>
    %50 = arith.mulf %49, %46 : vector<16x512xf32>
    %51 = arith.select %48, %46, %50 : vector<16x512xi1>, vector<16x512xf32>
    %c0_21 = arith.constant 0 : index
    %c0_22 = arith.constant 0 : index
    %c0_23 = arith.constant 0 : index
    %52 = vector.load %arg8[%c0_21, %c0_22, %c0_23] : memref<1x16x512xf32, #tpu.memory_space<vmem>>, vector<1x16x512xf32>
    %53 = vector.shape_cast %52 : vector<1x16x512xf32> to vector<16x512xf32>
    %54 = vector.shape_cast %51 : vector<16x512xf32> to vector<1x16x512xf32>
    tpu.vector_store %arg8[%c0_21, %c0_22, %c0_23], %54 {strides = array<i32>} : memref<1x16x512xf32, #tpu.memory_space<vmem>>, vector<1x16x512xf32>,
    return
  }
  func.func @transform_0(%arg0: i32, %arg1: i32) -> (i32, i32, i32, i32) {
    %c0_i32 = arith.constant 0 : i32
    %c0_i32_0 = arith.constant 0 : i32
    %c0_i32_1 = arith.constant 0 : i32
    return %arg0, %arg1, %c0_i32, %c0_i32_0 : i32, i32, i32, i32
  }
  func.func @transform_1(%arg0: i32, %arg1: i32) -> (i32, i32, i32) {
    %c0_i32 = arith.constant 0 : i32
    %c0_i32_0 = arith.constant 0 : i32
    return %arg0, %c0_i32, %arg1 : i32, i32, i32
  }
  func.func @transform_2(%arg0: i32, %arg1: i32) -> (i32, i32) {
    %c0_i32 = arith.constant 0 : i32
    %c0_i32_0 = arith.constant 0 : i32
    %c0_i32_1 = arith.constant 0 : i32
    return %c0_i32, %c0_i32_0 : i32, i32
  }
  func.func @transform_3(%arg0: i32, %arg1: i32) -> (i32, i32) {
    %c0_i32 = arith.constant 0 : i32
    %c0_i32_0 = arith.constant 0 : i32
    %c0_i32_1 = arith.constant 0 : i32
    return %c0_i32, %c0_i32_0 : i32, i32
  }
  func.func @transform_4(%arg0: i32, %arg1: i32) -> (i32, i32) {
    %c0_i32 = arith.constant 0 : i32
    %c0_i32_0 = arith.constant 0 : i32
    %c0_i32_1 = arith.constant 0 : i32
    return %c0_i32, %c0_i32_0 : i32, i32
  }
  func.func @transform_5(%arg0: i32, %arg1: i32) -> (i32, i32) {
    %c0_i32 = arith.constant 0 : i32
    %c0_i32_0 = arith.constant 0 : i32
    %c0_i32_1 = arith.constant 0 : i32
    return %c0_i32, %c0_i32_0 : i32, i32
  }
  func.func @transform_6(%arg0: i32, %arg1: i32) -> (i32, i32, i32) {
    %c0_i32 = arith.constant 0 : i32
    %c0_i32_0 = arith.constant 0 : i32
    return %arg0, %c0_i32, %arg1 : i32, i32, i32
  }
}

</mosaic_0001>

<bundles_post_ra>
// kernel: tpu_custom_call.1
= control target key start
LH: loop header
LB: loop body
LE: loop exit
PB: predicated region body
PF: predicated region fallthrough
CT: control target
= control target key end

     0   :  { %s2015_s0 = inlined_call_operand.vmem [shape: f32[2,2,16,4], index: 0, kind: input, shape index: {}]   ;;  %s2016_s1 = inlined_call_operand.hbm [shape: f32[2,16,1024], index: 1, kind: input, shape index: {}]   ;;  %s2017_s2 = inlined_call_operand.vmem [shape: f32[16,48], index: 2, kind: input, shape index: {}]   ;;  %s2018_s3 = inlined_call_operand.vmem [shape: f32[16,1], index: 3, kind: input, shape index: {}]   ;;  %s2019_s4 = inlined_call_operand.vmem [shape: f32[16,48], index: 4, kind: input, shape index: {}]   ;;  %s2020_s5 = inlined_call_operand.vmem [shape: f32[16,1], index: 5, kind: input, shape index: {}]   ;;  %s2021_s6 = inlined_call_operand.hbm [shape: f32[2,16,1024], index: 6, kind: output, shape index: {}]  }
   0x1   :  { %2027 = sst [smem:[#allocation12_spill]] %s2021_s6 }
   0x2   :  { %11 = vsyncpa [#allocation3], 0 }
   0x3   :  { %13 = vsyncpa [#allocation3 + $0x1], 0 }
   0x4   :  { %14 = vsyncpa [#allocation4], 0 }
   0x5   :  { %16 = vsyncpa [#allocation4 + $0x1], 0  ;;  %s1555_s21 = smov 0   ;;  %s1557_s22 = smov 0  }
   0x6   :  { %s1559_s23 = smov 0   ;;  %s1561_s24 = smov 0  }
   0x7   :  { %s1563_s25 = smov 0   ;;  %s1565_s26 = smov 0  }
   0x8   :  { %s1567_s27 = smov 0   ;;  %s1569_s28 = smov 0  }
   0x9 LB: > { %2028 = sst [smem:[#allocation8_spill]] %s1477_s21  ;;  %s1223_s29 = sadd.s32 4294967295, %s1505_s28   ;;  %s1505_s28 = sphi %s1569_s28, %s22_s28   ;;  %s1501_s27 = sphi %s1567_s27, %s2045_s27   ;;  %s1497_s26 = sphi %s1565_s26, %s2050_s26   ;;  %s1493_s25 = sphi %s1563_s25, %s2043_s25   ;;  %s1489_s24 = sphi %s1561_s24, %s2049_s24   ;;  %s1485_s23 = sphi %s1559_s23, %s2048_s23   ;;  %s1481_s22 = sphi %s1557_s22, %s2047_s22   ;;  %s1477_s21 = sphi %s1555_s21, %s2046_s21  }
   0xa   : > { %2029 = sst [smem:[#allocation9_spill]] %s1501_s27  ;;  %s1224_s30 = sadd.s32 4294967294, %s1505_s28  }
   0xb   : > { %s31_s7 = sadd.s32 1, %s1497_s26  ;;  %s34_s8 = sadd.s32 1, %s1501_s27 }
   0xc   : > { %p32_p0 = scmp.ge.s32.totalorder %s31_s7, 2  ;;  %s71_s9 = sadd.s32 1, %s1485_s23 }
   0xd   : > { %p78_p1 = scmp.ne.s32.totalorder %s1485_s23, %s1481_s22  ;;  %p79_p2 = scmp.eq.s32.totalorder %s1505_s28, 0 }
   0xe   : > { %s2052_s7 = smov (%p32_p0, %s31_s7), 0  ;;  %s2054_s8 = smov (!%p32_p0, %s34_s8), %s1501_s27 }
   0xf   : > { %2030 = sst [smem:[#allocation10_spill]] %s2052_s7  ;;  %s67_s10 = ssub.s32 %s1497_s26, %s2052_s7 }
  0x10   : > { %p1608_p3 = por %p79_p2, %p78_p1  ;;  %p36_p4 = scmp.ge.s32.totalorder %s2054_s8, 2 }
  0x11   : > { %p84_p5 = scmp.ne.s32.totalorder %s1481_s22, %s1477_s21  ;;  %p85_p6 = scmp.eq.s32.totalorder %s1223_s29, 0 }
  0x12   : > { %p194_p7 = scmp.eq.s32.totalorder %s1223_s29, 3  ;;  %s2056_s8 = smov (%p36_p4, %s2054_s8), 0 }
  0x13   : > { %2032 = sst [smem:[#allocation11_spill]] %s2056_s8  ;;  %p1616_p8 = por %p85_p6, %p84_p5 }
  0x14   : > { %p1620_p9 = por %p194_p7, %p78_p1  ;;  %s66_s14 = ssub.s32 %s1501_s27, %s2056_s8 }
  0x15   : > { %p200_p10 = scmp.eq.s32.totalorder %s1224_s30, 3  ;;  %s68_s15 = sor.u32 %s67_s10, %s66_s14 }
  0x16   : > { %p69_p11 = scmp.eq.s32.totalorder %s68_s15, 0  ;;  %p1302_p13 = scmp.lt.s32.totalorder %s1505_s28, 4 }
  0x17   : > { %p1626_p12 = por %p200_p10, %p84_p5  ;;  %s244_s17 = sand.u32 1, %s1485_s23  }
  0x18   : > { %s1633_s18 = scalar_select %p69_p11, %s1485_s23, %s71_s9  }
  0x19   : > { %s1227_s19 = sshll.u32 %s244_s17, 6  ;;  %s1228_s20 = sshll.u32 %s1497_s26, 2 }
  0x1a   : > { %s1229_s29 = sshll.u32 %s1501_s27, 4  ;;  %s248_s7 = scalar_lea.vmem [#allocation2], %s1227_s19 }
  0x1b   : > { %s257_s21 = sshll.u32 %s248_s7, 4  ;;  %s254_s6 = sadd.s32 %s1229_s29, %s1228_s20  ;;  %s258_s21 = int_to_ptr.vmem [resolvable:$true] %s257_s21 }
  0x1c   : > { %s1230_s8 = sshll.u32 %s254_s6, 7  ;;  %p1639_p0 = pnand %p1302_p13, %p1608_p3 }
  0x1d   : > { %s256_s15 = scalar_lea.hbm %s2016_s1, %s1230_s8  ;;  %p1231_p1 = scmp.ge.s32.totalorder %s1505_s28, 1 }
  0x1e   : > { %s245_s9 = scalar_lea.sflag [#allocation3], %s244_s17  ;;  %p1383_p2 = pneg %p1639_p0 }
  0x1f   : > { %s1394_s27 = scalar_lea.vmem %s258_s21, 1024  ;;  %s1507_s7 = smov [#allocation2]  }
  0x20   : > { %p1395_p4 = scmp.ne.s32.totalorder %s258_s21, %s1394_s27  ;;  %s1399_s6 = sshll.u32 %s1507_s7, 4  ;;  %s1400_s6 = int_to_ptr.vmem [resolvable:$false] %s1399_s6 }
  0x21   : > { %s1401_s11 = scalar_lea.vmem %s1400_s6, 2048  ;;  %p1402_p3 = scmp.lt.s32.totalorder %s258_s21, %s1400_s6 }
  0x22   : > { %p1397_p5 = pnand %p1395_p4, %p1383_p2  ;;  %p1403_p7 = scmp.lt.s32.totalorder %s1401_s11, %s1394_s27 }
  0x24   : > { %p1398_p6 = pneg %p1397_p5  ;;  %p1404_p10 = por %p1403_p7, %p1402_p3 }
  0x26   : > { %p1405_p11 = pnand %p1404_p10, %p1398_p6 }
  0x28   : > { %1408 = shalt.err (!%p1405_p11)
}
  0x29   : > { %s1508_s19 = smov 1024   ;;  %s1509_s8 = smov 512  }
  0x2a   : > { %s1510_s17 = smov 32   ;;  %p265_p13 = scmp.lt.s32.totalorder %s1505_s28, 5 }
  0x2b   : > { %1297 = dma.hbm_to_vmem [thread:$0]  (!%p1639_p0), %s256_s15, 1024, %s258_s21, %s245_s9, %s1508_s19, %s1509_s8, %s1510_s17  }
  0x2c   : > { %p266_p2 = pnand %p1231_p1, %p265_p13 }
  0x2d   : > { %s1655_s20 = sand.u32 (!%p266_p2), 1, %s1481_s22  }
  0x2e   : > { %269 = sbr.rel (%p266_p2) target bundleno = 906 (0x38a), region = 44  ;;  %s1232_s27 = sshll.u32 (!%p266_p2), %s1655_s20, 6 }
  0x2f   : > { %s272_s29 = scalar_lea.sflag (!%p266_p2), [#allocation3], %s1655_s20  ;;  %s275_s10 = scalar_lea.vmem (!%p266_p2), [#allocation2], %s1232_s27 }
  0x33   : > { %1468 = dma.done.wait (%p1616_p8), %s272_s29, 1024  }
  0x34   : > { %1470 = vsyncadd (%p1616_p8), %s272_s29, 4294966272  ;;  %v1665_v0 = vld [vmem:[%s275_s10 + $0x30] sm:$0xff]  ;;  %v1667_v1 = vld [vmem:[%s275_s10 + $0x20] sm:$0xff]  ;;  %s1511_s21 = smov 2   ;;  %p313_p8 = scmp.lt.s32.totalorder %s1493_s25, 1  ;;  %vm358_vm0 = vcmask 15360  }
  0x35   : > { %354 = vrot.lane.b32.xlu1 %v1665_v0, %s1511_s21  ;;  %350 = vrot.lane.b32.xlu0 %v1667_v1, %s1511_s21  ;;  %v1671_v2 = vld [vmem:[%s275_s10 + $0x28] sm:$0xff]  ;;  %v1673_v3 = vld [vmem:[%s275_s10] sm:$0xff]  ;;  %p315_p0 = scmp.lt.s32.totalorder %s1489_s24, 1  ;;  %s1512_s8 = smov 126   ;;  %v1514_v28 = vmov 0.0   ;;  %v1515_v31 = vmov 0  }
  0x36   : > { %v1677_v4 = vld [vmem:[%s275_s10 + $0x8] sm:$0xff]  ;;  %v1679_v5 = vld [vmem:[%s275_s10 + $0x10] sm:$0xff]  ;;  %v1683_v6 = vld [vmem:[%s275_s10 + $0x38] sm:$0xff]  ;;  %s314_s12 = scalar_select %p313_p8, %s1493_s25, 1  ;;  %546 = vmatprep.mubr.f32.mxu0 %v1514_v28  ;;  %623 = vmatprep.mubr.f32.mxu1 %v1514_v28  ;;  %vm442_vm1 = vcmask 1031168   ;;  %vm403_vm2 = vcmask 1039360  }
  0x37   : > { %v1685_v7 = vld [vmem:[%s275_s10 + $0x18] sm:$0xff]  ;;  %s316_s30 = scalar_select %p315_p0, %s1489_s24, 1  ;;  %v463_v29 = vld [vmem:[%s2018_s3] sm:$0xff]  ;;  %v464_v30 = vld [vmem:[%s2018_s3 + $0x8] sm:$0xff]  ;;  %1380 = vset.pattern.permute.xlu1 %v1515_v31  ;;  %1379 = vset.pattern.permute.xlu0 %v1515_v31  ;;  %vm475_vm3 = vcmask 392192  }
  0x38   : > { %s1235_s15 = sshll.u32 %s314_s12, 2  ;;  %s1513_s17 = smov 127  }
  0x39   : > { %352 = vrot.lane.b32.xlu0 %v1671_v2, %s1511_s21  ;;  %342 = vrot.lane.b32.xlu1 %v1673_v3, %s1511_s21  ;;  %s1234_s14 = sshll.u32 %s316_s30, 1  ;;  %p752_p1 = scmp.gt.s32.totalorder %s1489_s24, 0 }
  0x3a   : > { %s319_s9 = sadd.s32 %s1235_s15, %s1234_s14  ;;  %s1938_s30 = scalar_lea.vmem [#allocation5], %s1232_s27 }
  0x3b   : > { %s1236_s7 = sshll.u32 %s319_s9, 3  ;;  %s1250_s14 = sshll.u32 %s1489_s24, 2 }
  0x3c   : > { %s321_s19 = scalar_lea.vmem %s2015_s0, %s1236_s7  ;;  %s1251_s27 = sshll.u32 %s1493_s25, 4 }
  0x3d   : > { %344 = vrot.lane.b32.xlu0 %v1677_v4, %s1511_s21  ;;  %346 = vrot.lane.b32.xlu1 %v1679_v5, %s1511_s21  ;;  %v325_v14 = vld [vmem:[%s321_s19 + $0x8] sm:$0xff]  ;;  %v324_v22 = vld [vmem:[%s321_s19] sm:$0xff]  ;;  %s753_s7 = scalar_select %p752_p1, 1, 0 }
  0x3e   : > { %s767_s6 = scalar_select %p315_p0, 1, 0 }
  0x3f   : > { %s1109_s15 = sadd.s32 %s1251_s27, %s1250_s14  ;;  %s1112_s24 = sshll.u32 %s1938_s30, 4  ;;  %s1953_s24 = int_to_ptr.vmem [resolvable:$true] %s1112_s24 }
  0x40   : > { %s1252_s25 = sshll.u32 %s1109_s15, 7  ;;  %s1097_s19 = scalar_lea.sflag [#allocation4], %s1655_s20 }
  0x41   : > { %356 = vrot.lane.b32.xlu0 %v1683_v6, %s1511_s21  ;;  %348 = vrot.lane.b32.xlu1 %v1685_v7, %s1511_s21  ;;  %s1409_s29 = scalar_lea.vmem %s1953_s24, 1024  ;;  %s1516_s10 = smov [#allocation5]  }
  0x42   : > { %p1410_p4 = scmp.ne.s32.totalorder %s1953_s24, %s1409_s29 }
  0x44   : > { %p1411_p5 = pnand %p1410_p4, %p1620_p9 }
  0x46   : > { %p1412_p6 = pneg %p1411_p5 }
  0xa7   : > { %v355_v8 = vpop.permute.xlu1 %354  ;;  %v351_v9 = vpop.permute.xlu0 %350 }
  0xa8   : > { %v1712_v17 = vsel %vm358_vm0, %v325_v14, %v351_v9 }
  0xab   : > { %v353_v10 = vpop.permute.xlu0 %352  ;;  %v343_v11 = vpop.permute.xlu1 %342 }
  0xac   : > { %v1699_v12 = vsel %vm358_vm0, %v351_v9, %v353_v10  ;;  %v1702_v13 = vsel %vm358_vm0, %v353_v10, %v355_v8  ;;  %v1732_v24 = vsel %vm358_vm0, %v324_v22, %v343_v11  ;;  %v461_v10 = vld [vmem:[%s2017_s2] sm:$0xff] }
  0xad   : > { %434 = vrot.lane.b32.xlu0 %v1699_v12, %s1512_s8  ;;  %436 = vrot.lane.b32.xlu1 %v1702_v13, %s1512_s8 }
  0xaf   : > { %v345_v15 = vpop.permute.xlu0 %344  ;;  %v347_v18 = vpop.permute.xlu1 %346 }
  0xb0   : > { %v1709_v16 = vsel %vm358_vm0, %v343_v11, %v345_v15  ;;  %v1722_v21 = vsel %vm358_vm0, %v345_v15, %v347_v18 }
  0xb1   : > { %424 = vrot.lane.b32.xlu1 %v1709_v16, %s1512_s8  ;;  %432 = vrot.lane.b32.xlu0 %v1712_v17, %s1512_s8 }
  0xb3   : > { %v357_v19 = vpop.permute.xlu0 %356  ;;  %v349_v25 = vpop.permute.xlu1 %348 }
  0xb4   : > { %v1719_v20 = vsel %vm358_vm0, %v355_v8, %v357_v19  ;;  %v1729_v23 = vsel %vm358_vm0, %v357_v19, %v325_v14  ;;  %v1743_v26 = vsel %vm358_vm0, %v349_v25, %v324_v22  ;;  %v1746_v27 = vsel %vm358_vm0, %v347_v18, %v349_v25 }
  0xb5   : > { %438 = vrot.lane.b32.xlu1 %v1719_v20, %s1512_s8  ;;  %426 = vrot.lane.b32.xlu0 %v1722_v21, %s1512_s8 }
  0xb9   : > { %440 = vrot.lane.b32.xlu0 %v1729_v23, %s1512_s8  ;;  %422 = vrot.lane.b32.xlu1 %v1732_v24, %s1512_s8 }
  0xbd   : > { %395 = vrot.lane.b32.xlu0 %v1699_v12, %s1513_s17  ;;  %397 = vrot.lane.b32.xlu1 %v1702_v13, %s1513_s17 }
  0xc1   : > { %428 = vrot.lane.b32.xlu0 %v1746_v27, %s1512_s8  ;;  %430 = vrot.lane.b32.xlu1 %v1743_v26, %s1512_s8 }
  0xc5   : > { %393 = vrot.lane.b32.xlu0 %v1712_v17, %s1513_s17  ;;  %385 = vrot.lane.b32.xlu1 %v1709_v16, %s1513_s17 }
  0xc9   : > { %387 = vrot.lane.b32.xlu0 %v1722_v21, %s1513_s17  ;;  %399 = vrot.lane.b32.xlu1 %v1719_v20, %s1513_s17 }
  0xcd   : > { %401 = vrot.lane.b32.xlu0 %v1729_v23, %s1513_s17  ;;  %383 = vrot.lane.b32.xlu1 %v1732_v24, %s1513_s17 }
  0xd1   : > { %389 = vrot.lane.b32.xlu0 %v1746_v27, %s1513_s17  ;;  %391 = vrot.lane.b32.xlu1 %v1743_v26, %s1513_s17 }
  0xd5   : > { %467 = vperm.xlu1 %1380, %v463_v29   ;;  %472 = vperm.xlu0 %1379, %v464_v30  }
 0x11f   : > { %v435_v32 = vpop.permute.xlu0 %434  ;;  %v437_v33 = vpop.permute.xlu1 %436 }
 0x120   : > { %v448_v34 = vsel %vm442_vm1, %v435_v32, %v437_v33 }
 0x121   : > { %502 = vmatprep.subr.mxu0 %v448_v34 }
 0x123   : > { %v425_v35 = vpop.permute.xlu1 %424  ;;  %v433_v36 = vpop.permute.xlu0 %432 }
 0x124   : > { %v447_v37 = vsel %vm442_vm1, %v433_v36, %v435_v32 }
 0x125   : > { %503 = vmatpush1.msra.mxu0 %v447_v37 }
 0x127   : > { %v439_v38 = vpop.permute.xlu1 %438  ;;  %v427_v39 = vpop.permute.xlu0 %426 }
 0x128   : > { %v444_v40 = vsel %vm442_vm1, %v425_v35, %v427_v39  ;;  %v449_v45 = vsel %vm442_vm1, %v437_v33, %v439_v38 }
 0x129   : > { %504 = vmatprep.subr.mxu0 %v444_v40 }
 0x12b   : > { %v441_v41 = vpop.permute.xlu0 %440  ;;  %v423_v42 = vpop.permute.xlu1 %422 }
 0x12c   : > { %v443_v43 = vsel %vm442_vm1, %v423_v42, %v425_v35  ;;  %v450_v44 = vsel %vm442_vm1, %v439_v38, %v441_v41 }
 0x12d   : > { %505 = vmatpush1.msra.mxu0 %v443_v43  ;;  %579 = vmatprep.subr.mxu1 %v450_v44 }
 0x12e   : > { %580 = vmatpush1.msra.mxu1 %v449_v45 }
 0x12f   : > { %v396_v46 = vpop.permute.xlu0 %395  ;;  %v398_v47 = vpop.permute.xlu1 %397 }
 0x130   : > { %v409_v48 = vsel %vm403_vm2, %v396_v46, %v398_v47 }
 0x131   : > { %506 = vmatprep.subr.mxu0 %v409_v48  ;;  %v768_v48 = vstv %s767_s6  ;;  %s2041_s6 = sld [smem:[#allocation12_spill]] }
 0x132   : > { %vm769_vm15 = vcmp.eq.s32.totalorder %v768_v48, 1 }
 0x133   : > { %v429_v49 = vpop.permute.xlu0 %428  ;;  %v431_v50 = vpop.permute.xlu1 %430 }
 0x134   : > { %v446_v51 = vsel %vm442_vm1, %v429_v49, %v431_v50  ;;  %v445_v52 = vsel %vm442_vm1, %v427_v39, %v429_v49 }
 0x135   : > { %581 = vmatprep.subr.mxu1 %v446_v51 }
 0x136   : > { %582 = vmatpush1.msra.mxu1 %v445_v52 }
 0x137   : > { %v394_v53 = vpop.permute.xlu0 %393  ;;  %v386_v54 = vpop.permute.xlu1 %385  ;;  %s1960_s11 = scalar_lea.hbm %s2041_s6, %s1252_s25 }
 0x138   : > { %v408_v55 = vsel %vm403_vm2, %v394_v53, %v396_v46 }
 0x139   : > { %507 = vmatpush1.msra.mxu0 %v408_v55 }
 0x13b   : > { %v388_v56 = vpop.permute.xlu0 %387  ;;  %v400_v57 = vpop.permute.xlu1 %399 }
 0x13c   : > { %v405_v58 = vsel %vm403_vm2, %v386_v54, %v388_v56  ;;  %v410_v63 = vsel %vm403_vm2, %v398_v47, %v400_v57 }
 0x13d   : > { %508 = vmatprep.subr.mxu0 %v405_v58 }
 0x13f   : > { %v402_v59 = vpop.permute.xlu0 %401  ;;  %v384_v60 = vpop.permute.xlu1 %383 }
 0x140   : > { %v404_v61 = vsel %vm403_vm2, %v384_v60, %v386_v54  ;;  %v411_v62 = vsel %vm403_vm2, %v400_v57, %v402_v59 }
 0x141   : > { %509 = vmatpush1.msra.mxu0 %v404_v61  ;;  %583 = vmatprep.subr.mxu1 %v411_v62 }
 0x142   : > { %510 = vmatprep.subr.mxu0 %v1699_v12  ;;  %584 = vmatpush1.msra.mxu1 %v410_v63  ;;  %v462_v12 = vld [vmem:[%s2017_s2 + $0x8] sm:$0xff] }
 0x143   : > { %v390_v8 = vpop.permute.xlu0 %389  ;;  %511 = vmatpush1.msra.mxu0 %v1712_v17  ;;  %v392_v9 = vpop.permute.xlu1 %391 }
 0x144   : > { %512 = vmatprep.subr.mxu0 %v1709_v16  ;;  %v407_v11 = vsel %vm403_vm2, %v390_v8, %v392_v9  ;;  %v406_v14 = vsel %vm403_vm2, %v388_v56, %v390_v8  ;;  %v754_v16 = vstv %s753_s7 }
 0x145   : > { %513 = vmatpush1.msra.mxu0 %v1732_v24  ;;  %585 = vmatprep.subr.mxu1 %v407_v11  ;;  %vm755_vm5 = vcmp.eq.s32.totalorder %v754_v16, 1 }
 0x146   : > { %1237 = vmatmul.mubr.msk.f32.vlgmr.msra.gmra.mxu0 %vm475_vm3, %v461_v10  ;;  %586 = vmatpush1.msra.mxu1 %v406_v14  ;;  %v885_v14 = vld [vmem:[%s2020_s5 + $0x8] sm:$0xff] }
 0x147   : > { %1263 = vmatprep.subr.mxu0 %v441_v41  ;;  %587 = vmatprep.subr.mxu1 %v1719_v20 }
 0x148   : > { %1264 = vmatpush3.msra.mxu0 %v441_v41  ;;  %588 = vmatpush1.msra.mxu1 %v1702_v13  ;;  %v741_v13 = vlaneseq }
 0x149   : > { %1265 = vmatprep.subr.mxu0 %v431_v50  ;;  %589 = vmatprep.subr.mxu1 %v1746_v27 }
 0x14a   : > { %1266 = vmatpush3.msra.mxu0 %v431_v50  ;;  %590 = vmatpush1.msra.mxu1 %v1722_v21  ;;  %v742_v15 = vand.u32 127, %v741_v13 }
 0x14b   : > { %1267 = vmatprep.subr.mxu0 %v402_v59  ;;  %1239 = vmatmul.mubr.msk.f32.vlgmr.msra.gmra.mxu1 %vm475_vm3, %v461_v10 }
 0x14c   : > { %1268 = vmatpush3.msra.mxu0 %v402_v59  ;;  %552 = vmatprep.mubr.f32.mxu0 %v1514_v28  ;;  %vm747_vm4 = vcmp.gt.s32.totalorder %v742_v15, 0  ;;  %v746_v47 = vadd.s32 512, %v742_v15 }
 0x14d   : > { %1269 = vmatprep.subr.mxu0 %v392_v9  ;;  %1238 = vmatmul.mubr.msk.f32.gmra.mxu0 %vm475_vm3, %v462_v12  ;;  %vm1821_vm7 = vmor %vm747_vm4, %vm755_vm5 }
 0x14e   : > { %1270 = vmatpush3.msra.mxu0 %v392_v9  ;;  %629 = vmatprep.mubr.f32.mxu1 %v1514_v28  ;;  %vm765_vm14 = vcmp.lt.s32.totalorder %v746_v47, 513 }
 0x14f   : > { %1271 = vmatprep.subr.mxu0 %v1729_v23  ;;  %1240 = vmatmul.mubr.msk.f32.gmra.mxu1 %vm475_vm3, %v462_v12  ;;  %vm1860_vm0 = vmor %vm765_vm14, %vm769_vm15 }
 0x150   : > { %1272 = vmatpush3.msra.mxu0 %v1729_v23  ;;  %1275 = vmatprep.mubr.msk.f32.mxu0 %vm475_vm3, %v461_v10  ;;  %v468_v17 = vpop.permute.xlu1 %467  ;;  %v473_v25 = vpop.permute.xlu0 %472 }
 0x151   : > { %1273 = vmatprep.subr.mxu0 %v1743_v26  ;;  %966 = vmatprep.mubr.f32.mxu1 %v1514_v28 }
 0x152   : > { %1274 = vmatpush3.msra.mxu0 %v1743_v26 }
 0x153   : > { %1276 = vmatmul.mubr.msk.f32.vlgmr.msra.gmra.mxu0 %vm475_vm3, %v462_v12  ;;  %v884_v12 = vld [vmem:[%s2020_s5] sm:$0xff] }
 0x154   : > { %1043 = vmatprep.mubr.f32.mxu0 %v1514_v28 }
 0x206   : > { %v548_v18 = vpop.f32.mrf.mxu0 }
 0x207   : > { %v549_v19 = vadd.f32 %v548_v18, %v468_v17 }
 0x208   : > { %v550_v20 = vpop.f32.mrf.mxu0 }
 0x209   : > { %vm711_vm6 = vcmp.gt.f32.partialorder %v549_v19, 0.0  ;;  %v721_v21 = vmul.f32 0.01, %v549_v19  ;;  %v551_v26 = vadd.f32 %v550_v20, %v468_v17 }
 0x20b   : > { %v625_v23 = vpop.f32.mrf.mxu1  ;;  %v1825_v24 = vsel %vm711_vm6, %v549_v19, %v721_v21  ;;  %v722_v34 = vmul.f32 0.01, %v551_v26  ;;  %vm712_vm9 = vcmp.gt.f32.partialorder %v551_v26, 0.0 }
 0x20c   : > { %v626_v27 = vadd.f32 %v625_v23, %v468_v17  ;;  %v790_v29 = vsel %vm1821_vm7, %v1825_v24, 0.0 }
 0x20d   : > { %v627_v30 = vpop.f32.mrf.mxu1  ;;  %846 = vrot.lane.b32.xlu0 %v790_v29, %s1512_s8  ;;  %v554_v31 = vpop.f32.mrf.mxu0  ;;  %v1836_v39 = vsel %vm712_vm9, %v551_v26, %v722_v34 }
 0x20e   : > { %vm713_vm8 = vcmp.gt.f32.partialorder %v626_v27, 0.0  ;;  %v723_v32 = vmul.f32 0.01, %v626_v27  ;;  %v555_v33 = vadd.f32 %v554_v31, %v473_v25  ;;  %v628_v53 = vadd.f32 %v627_v30, %v468_v17 }
 0x20f   : > { %v631_v36 = vpop.f32.mrf.mxu1  ;;  %v556_v38 = vpop.f32.mrf.mxu0 }
 0x210   : > { %v1831_v35 = vsel %vm713_vm8, %v626_v27, %v723_v32  ;;  %v726_v37 = vmul.f32 0.01, %v555_v33  ;;  %vm716_vm10 = vcmp.gt.f32.partialorder %v555_v33, 0.0  ;;  %v632_v40 = vadd.f32 %v631_v36, %v473_v25 }
 0x211   : > { %850 = vrot.lane.b32.xlu1 %v1831_v35, %s1512_s8  ;;  %810 = vrot.lane.b32.xlu0 %v790_v29, %s1513_s17  ;;  %v557_v43 = vadd.f32 %v556_v38, %v473_v25  ;;  %v633_v55 = vpop.f32.mrf.mxu1  ;;  %v724_v59 = vmul.f32 0.01, %v628_v53  ;;  %vm714_vm4 = vcmp.gt.f32.partialorder %v628_v53, 0.0 }
 0x212   : > { %v1842_v41 = vsel %vm716_vm10, %v555_v33, %v726_v37  ;;  %v728_v45 = vmul.f32 0.01, %v632_v40  ;;  %vm718_vm11 = vcmp.gt.f32.partialorder %v632_v40, 0.0  ;;  %v634_v60 = vadd.f32 %v633_v55, %v473_v25 }
 0x213   : > { %v1277_v42 = vpop.f32.mrf.mxu0  ;;  %v795_v44 = vsel %vm1821_vm7, %v1842_v41, 0.0  ;;  %v727_v49 = vmul.f32 0.01, %v557_v43  ;;  %vm717_vm12 = vcmp.gt.f32.partialorder %v557_v43, 0.0  ;;  %v1868_v8 = vsel %vm714_vm4, %v628_v53, %v724_v59 }
 0x214   : > { %v708_v46 = vadd.f32 %v1277_v42, %v473_v25  ;;  %v1852_v50 = vsel %vm718_vm11, %v632_v40, %v728_v45  ;;  %v729_v63 = vmul.f32 0.01, %v634_v60  ;;  %vm719_vm6 = vcmp.gt.f32.partialorder %v634_v60, 0.0 }
 0x215   : > { %814 = vrot.lane.b32.xlu1 %v1831_v35, %s1513_s17  ;;  %848 = vrot.lane.b32.xlu0 %v1836_v39, %s1512_s8  ;;  %v702_v52 = vpop.f32.mrf.mxu0  ;;  %v737_v54 = vsel %vm717_vm12, %v557_v43, %v727_v49  ;;  %v882_v43 = vld [vmem:[%s2019_s4] sm:$0xff] }
 0x216   : > { %v730_v51 = vmul.f32 0.01, %v708_v46  ;;  %vm720_vm13 = vcmp.gt.f32.partialorder %v708_v46, 0.0  ;;  %v703_v56 = vadd.f32 %v702_v52, %v468_v17  ;;  %v1873_v10 = vsel %vm719_vm6, %v634_v60, %v729_v63 }
 0x218   : > { %v740_v57 = vsel %vm720_vm13, %v708_v46, %v730_v51  ;;  %v725_v62 = vmul.f32 0.01, %v703_v56  ;;  %vm715_vm5 = vcmp.gt.f32.partialorder %v703_v56, 0.0 }
 0x219   : > { %856 = vrot.lane.b32.xlu1 %v795_v44, %s1512_s8  ;;  %812 = vrot.lane.b32.xlu0 %v1836_v39, %s1513_s17  ;;  %v799_v61 = vsel %vm1860_vm0, %v740_v57, 0.0 }
 0x21a   : > { %v735_v9 = vsel %vm715_vm5, %v703_v56, %v725_v62 }
 0x21b   : > { %v794_v11 = vsel %vm1860_vm0, %v735_v9, 0.0 }
 0x21d   : > { %820 = vrot.lane.b32.xlu1 %v795_v44, %s1513_s17  ;;  %860 = vrot.lane.b32.xlu0 %v1852_v50, %s1512_s8 }
 0x221   : > { %858 = vrot.lane.b32.xlu1 %v737_v54, %s1512_s8  ;;  %824 = vrot.lane.b32.xlu0 %v1852_v50, %s1513_s17 }
 0x225   : > { %822 = vrot.lane.b32.xlu1 %v737_v54, %s1513_s17  ;;  %864 = vrot.lane.b32.xlu0 %v799_v61, %s1512_s8 }
 0x229   : > { %852 = vrot.lane.b32.xlu1 %v1868_v8, %s1512_s8  ;;  %828 = vrot.lane.b32.xlu0 %v799_v61, %s1513_s17 }
 0x22d   : > { %862 = vrot.lane.b32.xlu1 %v1873_v10, %s1512_s8  ;;  %854 = vrot.lane.b32.xlu0 %v794_v11, %s1512_s8  ;;  %s1413_s8 = sshll.u32 %s1516_s10, 4  ;;  %s1414_s8 = int_to_ptr.vmem [resolvable:$false] %s1413_s8 }
 0x22e   : > { %p1416_p3 = scmp.lt.s32.totalorder %s1953_s24, %s1414_s8 }
 0x231   : > { %826 = vrot.lane.b32.xlu1 %v1873_v10, %s1513_s17  ;;  %818 = vrot.lane.b32.xlu0 %v794_v11, %s1513_s17 }
 0x235   : > { %816 = vrot.lane.b32.xlu1 %v1868_v8, %s1513_s17  ;;  %893 = vperm.xlu0 %1379, %v885_v14   ;;  %s1415_s17 = scalar_lea.vmem %s1414_s8, 2048 }
 0x236   : > { %p1417_p7 = scmp.lt.s32.totalorder %s1415_s17, %s1409_s29 }
 0x238   : > { %p1418_p10 = por %p1417_p7, %p1416_p3 }
 0x239   : > { %888 = vperm.xlu1 %1380, %v884_v12  }
 0x23a   : > { %p1419_p11 = pnand %p1418_p10, %p1412_p6 }
 0x27f   : > { %v847_v13 = vpop.permute.xlu0 %846 }
 0x283   : > { %v851_v15 = vpop.permute.xlu1 %850  ;;  %v811_v16 = vpop.permute.xlu0 %810 }
 0x287   : > { %v815_v17 = vpop.permute.xlu1 %814  ;;  %v849_v18 = vpop.permute.xlu0 %848 }
 0x288   : > { %v867_v30 = vsel %vm442_vm1, %v849_v18, %v851_v15  ;;  %v866_v31 = vsel %vm442_vm1, %v847_v13, %v849_v18 }
 0x28b   : > { %v857_v19 = vpop.permute.xlu1 %856  ;;  %v813_v20 = vpop.permute.xlu0 %812 }
 0x28c   : > { %v831_v37 = vsel %vm403_vm2, %v813_v20, %v815_v17  ;;  %v830_v38 = vsel %vm403_vm2, %v811_v16, %v813_v20 }
 0x28f   : > { %v821_v21 = vpop.permute.xlu1 %820  ;;  %v861_v23 = vpop.permute.xlu0 %860 }
 0x293   : > { %v859_v25 = vpop.permute.xlu1 %858  ;;  %v825_v26 = vpop.permute.xlu0 %824 }
 0x294   : > { %v870_v27 = vsel %vm442_vm1, %v857_v19, %v859_v25  ;;  %v871_v29 = vsel %vm442_vm1, %v859_v25, %v861_v23 }
 0x295   : > { %922 = vmatprep.subr.mxu1 %v871_v29 }
 0x296   : > { %923 = vmatpush1.msra.mxu1 %v870_v27 }
 0x297   : > { %v823_v32 = vpop.permute.xlu1 %822  ;;  %924 = vmatprep.subr.mxu1 %v867_v30  ;;  %v865_v33 = vpop.permute.xlu0 %864 }
 0x298   : > { %v834_v34 = vsel %vm403_vm2, %v821_v21, %v823_v32  ;;  %925 = vmatpush1.msra.mxu1 %v866_v31  ;;  %v835_v36 = vsel %vm403_vm2, %v823_v32, %v825_v26 }
 0x299   : > { %926 = vmatprep.subr.mxu1 %v835_v36 }
 0x29a   : > { %927 = vmatpush1.msra.mxu1 %v834_v34 }
 0x29b   : > { %v853_v40 = vpop.permute.xlu1 %852  ;;  %928 = vmatprep.subr.mxu1 %v831_v37  ;;  %v829_v42 = vpop.permute.xlu0 %828 }
 0x29c   : > { %929 = vmatpush1.msra.mxu1 %v830_v38  ;;  %v868_v49 = vsel %vm442_vm1, %v851_v15, %v853_v40 }
 0x29d   : > { %930 = vmatprep.subr.mxu1 %v737_v54 }
 0x29e   : > { %1243 = vmatpush1.msk.msra.mxu1 %vm1821_vm7, %v1842_v41 }
 0x29f   : > { %v863_v44 = vpop.permute.xlu1 %862  ;;  %932 = vmatprep.subr.mxu1 %v1836_v39  ;;  %v855_v45 = vpop.permute.xlu0 %854  ;;  %v883_v39 = vld [vmem:[%s2019_s4 + $0x8] sm:$0xff] }
 0x2a0   : > { %v872_v46 = vsel %vm442_vm1, %v861_v23, %v863_v44  ;;  %1244 = vmatpush1.msk.msra.mxu1 %vm1821_vm7, %v1825_v24  ;;  %v873_v47 = vsel %vm442_vm1, %v863_v44, %v865_v33  ;;  %v869_v41 = vsel %vm442_vm1, %v853_v40, %v855_v45 }
 0x2a1   : > { %1245 = vmatmul.mubr.msk.f32.vlgmr.msra.gmra.mxu1 %vm475_vm3, %v882_v43  ;;  %999 = vmatprep.subr.mxu0 %v873_v47 }
 0x2a2   : > { %1278 = vmatprep.subr.mxu1 %v873_v47  ;;  %1000 = vmatpush1.msra.mxu0 %v872_v46 }
 0x2a3   : > { %1284 = vmatpush1.msra.mxu1 %v872_v46  ;;  %v827_v48 = vpop.permute.xlu1 %826  ;;  %1001 = vmatprep.subr.mxu0 %v869_v41  ;;  %v819_v51 = vpop.permute.xlu0 %818 }
 0x2a4   : > { %v836_v22 = vsel %vm403_vm2, %v825_v26, %v827_v48  ;;  %1279 = vmatprep.subr.mxu1 %v869_v41  ;;  %972 = vmatprep.mubr.f32.mxu1 %v1514_v28  ;;  %v837_v24 = vsel %vm403_vm2, %v827_v48, %v829_v42 }
 0x2a5   : > { %1002 = vmatpush1.msra.mxu0 %v868_v49  ;;  %1285 = vmatpush1.msra.mxu1 %v868_v49 }
 0x2a6   : > { %1246 = vmatmul.mubr.msk.f32.gmra.mxu1 %vm475_vm3, %v883_v39  ;;  %1003 = vmatprep.subr.mxu0 %v837_v24 }
 0x2a7   : > { %1280 = vmatprep.subr.mxu1 %v837_v24  ;;  %1004 = vmatpush1.msra.mxu0 %v836_v22  ;;  %v817_v52 = vpop.permute.xlu1 %816 }
 0x2a8   : > { %1286 = vmatpush1.msra.mxu1 %v836_v22  ;;  %v832_v53 = vsel %vm403_vm2, %v815_v17, %v817_v52  ;;  %v833_v54 = vsel %vm403_vm2, %v817_v52, %v819_v51  ;;  %1049 = vmatprep.mubr.f32.mxu1 %v1514_v28 }
 0x2a9   : > { %1005 = vmatprep.subr.mxu0 %v833_v54  ;;  %1281 = vmatprep.subr.mxu1 %v833_v54 }
 0x2aa   : > { %1006 = vmatpush1.msra.mxu0 %v832_v53  ;;  %1287 = vmatpush1.msra.mxu1 %v832_v53 }
 0x2ab   : > { %1007 = vmatprep.subr.mxu0 %v1873_v10  ;;  %1282 = vmatprep.subr.mxu1 %v1873_v10 }
 0x2ac   : > { %1008 = vmatpush1.msra.mxu0 %v1852_v50  ;;  %1288 = vmatpush1.msra.mxu1 %v1852_v50 }
 0x2ad   : > { %1009 = vmatprep.subr.mxu0 %v1868_v8  ;;  %1283 = vmatprep.subr.mxu1 %v1868_v8 }
 0x2ae   : > { %1010 = vmatpush1.msra.mxu0 %v1831_v35  ;;  %1289 = vmatpush1.msra.mxu1 %v1831_v35 }
 0x2af   : > { %1247 = vmatmul.mubr.msk.f32.vlgmr.msra.gmra.mxu0 %vm475_vm3, %v882_v43  ;;  %1248 = vmatmul.mubr.msk.f32.vlgmr.msra.gmra.mxu1 %vm475_vm3, %v883_v39 }
 0x2b0   : > { %v894_v59 = vpop.permute.xlu0 %893 }
 0x2b4   : > { %v889_v28 = vpop.permute.xlu1 %888 }
 0x361   : > { %v968_v55 = vpop.f32.mrf.mxu1 }
 0x362   : > { %v969_v56 = vadd.f32 %v968_v55, %v889_v28 }
 0x363   : > { %v970_v57 = vpop.f32.mrf.mxu1 }
 0x364   : > { %v1056_v58 = vadd.f32 %v969_v56, %v1673_v3  ;;  %v971_v50 = vadd.f32 %v970_v57, %v889_v28 }
 0x366   : > { %vm1064_vm1 = vcmp.gt.f32.partialorder %v1056_v58, 0.0  ;;  %v1072_v60 = vmul.f32 0.01, %v1056_v58  ;;  %v1057_v61 = vadd.f32 %v971_v50, %v1677_v4  ;;  %v974_v62 = vpop.f32.mrf.mxu1 }
 0x367   : > { %v975_v63 = vadd.f32 %v974_v62, %v894_v59 }
 0x368   : > { %v1080_v35 = vsel %vm1064_vm1, %v1056_v58, %v1072_v60  ;;  %vm1065_vm2 = vcmp.gt.f32.partialorder %v1057_v61, 0.0  ;;  %v1073_v8 = vmul.f32 0.01, %v1057_v61  ;;  %v976_v9 = vpop.f32.mrf.mxu1 }
 0x369   : > { %1088 = vst [vmem:[%s1938_s30] sm:$0xff] %v1080_v35  ;;  %v1060_v3 = vadd.f32 %v975_v63, %v1667_v1  ;;  %v977_v10 = vadd.f32 %v976_v9, %v894_v59 }
 0x36a   : > { %v1081_v4 = vsel %vm1065_vm2, %v1057_v61, %v1073_v8 }
 0x36b   : > { %1089 = vst [vmem:[%s1938_s30 + $0x8] sm:$0xff] %v1081_v4  ;;  %vm1068_vm3 = vcmp.gt.f32.partialorder %v1060_v3, 0.0  ;;  %v1076_v11 = vmul.f32 0.01, %v1060_v3  ;;  %v1061_v14 = vadd.f32 %v977_v10, %v1671_v2 }
 0x36d   : > { %v1084_v12 = vsel %vm1068_vm3, %v1060_v3, %v1076_v11  ;;  %vm1069_vm7 = vcmp.gt.f32.partialorder %v1061_v14, 0.0  ;;  %v1077_v13 = vmul.f32 0.01, %v1061_v14 }
 0x36e   : > { %1092 = vst [vmem:[%s1938_s30 + $0x20] sm:$0xff] %v1084_v12 }
 0x36f   : > { %v1085_v15 = vsel %vm1069_vm7, %v1061_v14, %v1077_v13  ;;  %v1045_v16 = vpop.f32.mrf.mxu0  ;;  %v1051_v17 = vpop.f32.mrf.mxu1 }
 0x370   : > { %1093 = vst [vmem:[%s1938_s30 + $0x28] sm:$0xff] %v1085_v15  ;;  %v1046_v1 = vadd.f32 %v1045_v16, %v889_v28  ;;  %v1052_v18 = vadd.f32 %v1051_v17, %v894_v59 }
 0x371   : > { %v1047_v19 = vpop.f32.mrf.mxu0  ;;  %v1053_v20 = vpop.f32.mrf.mxu1 }
 0x372   : > { %v1058_v21 = vadd.f32 %v1046_v1, %v1679_v5  ;;  %v1062_v2 = vadd.f32 %v1052_v18, %v1665_v0  ;;  %v1048_v23 = vadd.f32 %v1047_v19, %v889_v28  ;;  %v1054_v25 = vadd.f32 %v1053_v20, %v894_v59 }
 0x374   : > { %vm1066_vm8 = vcmp.gt.f32.partialorder %v1058_v21, 0.0  ;;  %v1074_v26 = vmul.f32 0.01, %v1058_v21  ;;  %vm1070_vm9 = vcmp.gt.f32.partialorder %v1062_v2, 0.0  ;;  %v1078_v27 = vmul.f32 0.01, %v1062_v2 }
 0x375   : > { %v1059_v29 = vadd.f32 %v1048_v23, %v1685_v7  ;;  %v1063_v30 = vadd.f32 %v1054_v25, %v1683_v6 }
 0x376   : > { %v1082_v31 = vsel %vm1066_vm8, %v1058_v21, %v1074_v26  ;;  %v1086_v5 = vsel %vm1070_vm9, %v1062_v2, %v1078_v27 }
 0x377   : > { %1090 = vst [vmem:[%s1938_s30 + $0x10] sm:$0xff] %v1082_v31  ;;  %1094 = vst [vmem:[%s1938_s30 + $0x30] sm:$0xff] %v1086_v5  ;;  %vm1067_vm10 = vcmp.gt.f32.partialorder %v1059_v29, 0.0  ;;  %v1075_v0 = vmul.f32 0.01, %v1059_v29  ;;  %vm1071_vm11 = vcmp.gt.f32.partialorder %v1063_v30, 0.0 }
 0x378   : > { %v1079_v32 = vmul.f32 0.01, %v1063_v30 }
 0x379   : > { %v1083_v6 = vsel %vm1067_vm10, %v1059_v29, %v1075_v0 }
 0x37a   : > { %v1087_v7 = vsel %vm1071_vm11, %v1063_v30, %v1079_v32  ;;  %1091 = vst [vmem:[%s1938_s30 + $0x18] sm:$0xff] %v1083_v6 }
 0x37b   : > { %1095 = vst [vmem:[%s1938_s30 + $0x38] sm:$0xff] %v1087_v7 }
 0x37c   : > { %1422 = shalt.err (!%p1419_p11)
}
 0x37d   : > { %s1423_s21 = scalar_lea.hbm %s1960_s11, 1024  ;;  %s1427_s14 = scalar_lea.hbm %s2041_s6, 4096 }
 0x37e   : > { %p1424_p13 = scmp.ne.s32.totalorder %s1960_s11, %s1423_s21  ;;  %p1428_p0 = scmp.lt.s32.totalorder %s1960_s11, %s2041_s6 }
 0x37f   : > { %p1429_p1 = scmp.lt.s32.totalorder %s1427_s14, %s1423_s21 }
 0x380   : > { %p1425_p2 = pnand %p1424_p13, %p1620_p9 }
 0x381   : > { %p1430_p4 = por %p1429_p1, %p1428_p0 }
 0x382   : > { %p1426_p8 = pneg %p1425_p2 }
 0x384   : > { %p1431_p5 = pnand %p1430_p4, %p1426_p8 }
 0x386   : > { %1434 = shalt.err (!%p1431_p5)
}
 0x387   : > { %s1517_s25 = smov 512   ;;  %s1518_s9 = smov 1024  }
 0x388   : > { %s1519_s7 = smov 32  }
 0x389   : > { %1292 = dma.vmem_to_hbm [thread:$0]  (%p1620_p9), %s1953_s24, 1024, %s1960_s11, %s1097_s19, %s1517_s25, %s1518_s9, %s1519_s7  }
 0x38a PF: > { %s2042_s29 = sld [smem:[#allocation8_spill]]  ;;  %p1303_p6 = scmp.ge.s32.totalorder %s1505_s28, 2 }
 0x38c   : > { %p1299_p3 = pnand %p1303_p6, %p1626_p12 }
 0x38e   : > { %p1300_p7 = pneg %p1299_p3 }
 0x390   : > { %s1127_s10 = sand.u32 1, %s2042_s29  }
 0x391   : > { %s1128_s8 = scalar_lea.sflag [#allocation4], %s1127_s10 }
 0x392   : > { %1472 = dma.done.wait (%p1300_p7), %s1128_s8, 1024  }
 0x393   : > { %1474 = vsyncadd (%p1300_p7), %s1128_s8, 4294966272  ;;  %s22_s28 = sadd.s32 1, %s1505_s28   ;;  %s2043_s25 = sld [smem:[#allocation9_spill]] }
 0x394   : > { %p19_p10 = scmp.ge.s32.totalorder %s22_s28, 6   ;;  %s2044_s13 = sld [smem:[#allocation10_spill]] }
 0x395   : > { %s2045_s27 = sld [smem:[#allocation11_spill]]  ;;  %s2046_s21 = smov %s1481_s22 }
 0x396   : > { %s2047_s22 = smov %s1485_s23  ;;  %s2048_s23 = smov %s1633_s18 }
 0x397   : > { %s2049_s24 = smov %s1497_s26  ;;  %21 = sbr.rel (!%p19_p10) target bundleno = 9 (0x9), region = 92 }
 0x39a   : > { %s2050_s26 = smov %s2044_s13 }
 0x39c   :  { %1133 = vsyncpa [#allocation3], 1 }
 0x39d   :  { %1135 = vsyncpa [#allocation3 + $0x1], 1 }
 0x39e   :  { %1136 = vsyncpa [#allocation4], 1 }
 0x39f   :  { %1138 = vsyncpa [#allocation4 + $0x1], 1 }

</bundles_post_ra>
